<compile_context>
chip_gen: v6e
topology: v6e:2x2x1
jax: 0.10.0
libtpu: 0.0.40
codegen_flags: <defaults>
</compile_context>

<pallas_src>
import functools

import jax
import jax.numpy as jnp
from jax.experimental import pallas as pl
from jax.experimental.pallas import tpu as pltpu


def _infer_num_groups(num_features: int) -> int:
    # Mirrors BCNorm.__init__ group inference.
    num_groups, remainder = divmod(num_features, 16)
    if remainder:
        num_groups = num_features // remainder
    return num_groups


def _round_up(v: int, m: int) -> int:
    return (v + m - 1) // m * m


def _vmem_budget_bytes() -> int:
    """Per-TensorCore VMEM budget with ~25% headroom for compiler scratch/pipelining.

    Per-TC capacities: 128 MiB (v5e/v6e), 64 MiB (v7x). The query result is clamped in
    case it reports something unexpected (e.g. chip-level capacity on a 2-core chip)."""
    cap = 64 << 20
    try:
        cap = int(pltpu.get_tpu_info().vmem_capacity_bytes)
    except Exception:
        pass
    cap = max(32 << 20, min(cap, 128 << 20))
    return (cap * 3) // 4


def _derive_affine(s_nc, q_nc, bnw, bnb, gw, gb, *, bn_eps, gn_eps, n, cg, hw_real):
    """From per-(n, channel) sums of u = x - c and u*u over the real spatial extent,
    derive (A, B) such that out = A * u + B reproduces
    BatchNorm2d(training) -> per-(sample, group) norm -> per-group affine."""
    inv_bn_count = 1.0 / float(n * hw_real)
    inv_hw = 1.0 / float(hw_real)
    inv_cg = 1.0 / float(cg)

    # stage 1: BatchNorm2d training statistics (per channel over N, HW), biased var
    s_c = jnp.sum(s_nc, axis=0, keepdims=True)          # (1, 1, Cg, 1)
    q_c = jnp.sum(q_nc, axis=0, keepdims=True)
    mu_c = s_c * inv_bn_count                            # E[u] per channel
    var_c = q_c * inv_bn_count - mu_c * mu_c             # Var(x) == Var(u)
    a_c = bnw * jax.lax.rsqrt(var_c + bn_eps)
    bp_c = bnb - a_c * mu_c                              # xb = a_c * u + bp_c

    # stage 2: per-(sample, group) statistics of xb, derived analytically from the sums
    m_nc = s_nc * inv_hw                                 # E_hw[u] per (n, c)
    e2_nc = q_nc * inv_hw                                # E_hw[u^2] per (n, c)
    exb_nc = a_c * m_nc + bp_c                           # E_hw[xb]
    exb2_nc = a_c * a_c * e2_nc + 2.0 * (a_c * bp_c) * m_nc + bp_c * bp_c
    mean_g = jnp.sum(exb_nc, axis=2, keepdims=True) * inv_cg      # (N, 1, 1, 1)
    exb2_g = jnp.sum(exb2_nc, axis=2, keepdims=True) * inv_cg
    var_g = exb2_g - mean_g * mean_g
    inv_g = jax.lax.rsqrt(var_g + gn_eps)

    # stage 3: fold the per-group affine in -> a single fused multiply-add
    A = gw * inv_g * a_c                                 # (N, 1, Cg, 1)
    B = gw * inv_g * (bp_c - mean_g) + gb                # (N, 1, Cg, 1)
    return A, B


# --------------------------- fused single-block-per-group path -----------------------

def _bcn_group_kernel(x_ref, gw_ref, gb_ref, bnw_ref, bnb_ref, o_ref, *,
                      bn_eps, gn_eps, chunk):
    """One (N, 1, Cg, HW) group block resident in VMEM (native dtype).  Statistics and
    the fused affine apply stream over HW in `chunk`-lane pieces, so the only large
    VMEM tenants are the (double-buffered) in/out blocks."""
    n, _, cg, hw = x_ref.shape
    n_full = hw // chunk
    tail = hw - n_full * chunk

    # Per-channel shift (first sample / first spatial position): keeps the
    # E[u^2] - E[u]^2 variance form well conditioned without a second stats pass.
    c = x_ref[0:1, :, :, 0:1].astype(jnp.float32)        # (1, 1, Cg, 1)

    def chunk_sums(xc):
        u = xc.astype(jnp.float32) - c
        return (jnp.sum(u, axis=3, keepdims=True),
                jnp.sum(u * u, axis=3, keepdims=True))

    s_nc = jnp.zeros((n, 1, cg, 1), jnp.float32)
    q_nc = jnp.zeros((n, 1, cg, 1), jnp.float32)
    if n_full > 0:
        def stats_body(i, carry):
            s, q = carry
            off = pl.multiple_of(i * chunk, 128)
            ds_, dq_ = chunk_sums(x_ref[:, :, :, pl.ds(off, chunk)])
            return s + ds_, q + dq_
        s_nc, q_nc = jax.lax.fori_loop(0, n_full, stats_body, (s_nc, q_nc))
    if tail > 0:                                         # ragged tail (static width)
        ds_, dq_ = chunk_sums(x_ref[:, :, :, pl.ds(n_full * chunk, tail)])
        s_nc = s_nc + ds_
        q_nc = q_nc + dq_

    A, B = _derive_affine(
        s_nc, q_nc,
        bnw_ref[...].astype(jnp.float32), bnb_ref[...].astype(jnp.float32),
        gw_ref[...].astype(jnp.float32), gb_ref[...].astype(jnp.float32),
        bn_eps=bn_eps, gn_eps=gn_eps, n=n, cg=cg, hw_real=hw)
    Bx = B - A * c                                       # u-space -> x-space: o = A*x+Bx

    def apply_chunk(off, width):
        xc = x_ref[:, :, :, pl.ds(off, width)].astype(jnp.float32)
        o_ref[:, :, :, pl.ds(off, width)] = (A * xc + Bx).astype(o_ref.dtype)

    if n_full > 0:
        @pl.loop(0, n_full)
        def _(i):
            apply_chunk(pl.multiple_of(i * chunk, 128), chunk)
    if tail > 0:
        apply_chunk(n_full * chunk, tail)


# ------------------------ two-pass gridded path (large activations) ------------------

def _bcn_stats_kernel(x_ref, gw_ref, gb_ref, bnw_ref, bnb_ref,
                      a_ref, b_ref, s_acc, q_acc, c_acc, *,
                      bn_eps, gn_eps, hw_real):
    n, _, cg, t_lanes = x_ref.shape
    t = pl.program_id(1)
    xf = x_ref[...].astype(jnp.float32)                  # (N, 1, Cg, T)

    @pl.when(t == 0)
    def _():
        s_acc[...] = jnp.zeros_like(s_acc)
        q_acc[...] = jnp.zeros_like(q_acc)
        c_acc[...] = xf[0:1, :, :, 0:1]                  # per-channel shift

    c = c_acc[...]
    lane = jax.lax.broadcasted_iota(jnp.int32, (1, 1, 1, t_lanes), 3) + t * t_lanes
    u = jnp.where(lane < hw_real, xf - c, 0.0)           # mask zero-padded lanes

    # Deferred cross-lane reduction: accumulate 128-wide per-lane partials with VALU
    # adds only; the XLU lane reduce happens once, in the epilogue.
    for j in range(t_lanes // 128):
        uj = u[:, :, :, j * 128:(j + 1) * 128]
        s_acc[...] += uj
        q_acc[...] += uj * uj

    @pl.when(t == pl.num_programs(1) - 1)
    def _():
        s_nc = jnp.sum(s_acc[...], axis=3, keepdims=True)
        q_nc = jnp.sum(q_acc[...], axis=3, keepdims=True)
        A, B = _derive_affine(
            s_nc, q_nc,
            bnw_ref[...].astype(jnp.float32), bnb_ref[...].astype(jnp.float32),
            gw_ref[...].astype(jnp.float32), gb_ref[...].astype(jnp.float32),
            bn_eps=bn_eps, gn_eps=gn_eps, n=n, cg=cg, hw_real=hw_real)
        a_ref[...] = A
        b_ref[...] = B - A * c_acc[...]                  # convert u-space -> x-space


def _bcn_apply_kernel(x_ref, a_ref, b_ref, o_ref):
    xf = x_ref[...].astype(jnp.float32)
    o_ref[...] = (a_ref[...] * xf + b_ref[...]).astype(o_ref.dtype)


# ------------------------------------- wrapper ---------------------------------------

def bcnorm_pallas(x, group_weight, group_bias, bn_weight, bn_bias, *,
                  eps: float = 1e-7, bn_eps: float = 1e-5,
                  force_two_pass: bool = False, vmem_budget_bytes=None):
    """x: (N, C, H, W). Returns (N, C, H, W) in x.dtype."""
    N, C, H, W = x.shape
    G = _infer_num_groups(C)
    assert C % G == 0, "inferred groups must divide channels"
    Cg = C // G
    HW = H * W
    HW_128 = _round_up(HW, 128)

    device_budget = _vmem_budget_bytes()
    budget = int(vmem_budget_bytes) if vmem_budget_bytes is not None else device_budget
    # Never let the fused block require more than ~48 MiB: keeps us inside a v7x
    # TensorCore's 64 MiB VMEM even if the capacity query over-reports.
    fused_budget = min(budget, 48 << 20)

    isz = x.dtype.itemsize
    sub = max(8, 32 // isz)                              # sublane granularity for dtype
    Cg_pad = _round_up(Cg, sub)

    # Glue reshapes only; keep the native dtype for HBM traffic (kernels upcast to f32).
    xr = x.reshape(N, G, Cg, HW)
    gw = group_weight.reshape(1, G, 1, 1)
    gb = group_bias.reshape(1, G, 1, 1)
    bw = bn_weight.reshape(1, G, Cg, 1)
    bb = bn_bias.reshape(1, G, Cg, 1)

    def cparams(sem):
        return pltpu.CompilerParams(dimension_semantics=sem,
                                    vmem_limit_bytes=device_budget)

    # ---- fused-path feasibility -------------------------------------------------
    # In-kernel HW streaming chunk (multiple of 128 lanes); f32 temporaries are only
    # chunk-sized, so per-element VMEM is ~4*itemsize (dbl-buffered in + out).
    per_chunk_f32 = N * Cg_pad * 16
    max_chunk = max(128, (fused_budget // 8) // max(per_chunk_f32, 1) // 128 * 128)
    chunk = max(128, min(HW_128, 2048, max_chunk))
    fused_vmem = (N * Cg_pad * HW_128 * 4 * isz          # dbl-buffered in + out
                  + N * Cg_pad * chunk * 16              # chunk-sized f32 temporaries
                  + N * Cg_pad * 64)                     # coefficient / stats vectors
    total_bytes = N * C * HW * isz
    # With <4 grid steps (<2 per core on v7x megacore) BlockSpec pipelining can't hide
    # the DMAs; for large activations prefer the gridded scheme, which overlaps.
    few_steps_large = (G < 4) and (total_bytes > (4 << 20))
    use_fused = (not force_two_pass) and (fused_vmem <= fused_budget) and not few_steps_large

    if use_fused:
        # No wrapper pad / slice: block last-two dims equal the full (Cg, HW) array dims,
        # so a non-128-multiple HW only costs masked stores on the tail vreg.
        kernel = functools.partial(_bcn_group_kernel, bn_eps=float(bn_eps),
                                   gn_eps=float(eps), chunk=int(chunk))
        cost = pl.CostEstimate(flops=int(8 * N * C * HW),
                               transcendentals=int(N * C),
                               bytes_accessed=int(2 * N * C * HW * isz))
        out = pl.pallas_call(
            kernel,
            out_shape=jax.ShapeDtypeStruct((N, G, Cg, HW), x.dtype),
            grid=(G,),
            in_specs=[
                pl.BlockSpec((N, 1, Cg, HW), lambda g: (0, g, 0, 0)),
                pl.BlockSpec((1, 1, 1, 1), lambda g: (0, g, 0, 0)),
                pl.BlockSpec((1, 1, 1, 1), lambda g: (0, g, 0, 0)),
                pl.BlockSpec((1, 1, Cg, 1), lambda g: (0, g, 0, 0)),
                pl.BlockSpec((1, 1, Cg, 1), lambda g: (0, g, 0, 0)),
            ],
            out_specs=pl.BlockSpec((N, 1, Cg, HW), lambda g: (0, g, 0, 0)),
            compiler_params=cparams(("parallel",)),
            cost_estimate=cost,
        )(xr, gw, gb, bw, bb)
        return out.reshape(N, C, H, W)

    # ---- two-pass gridded path --------------------------------------------------
    # Pad only to a 128-lane multiple; pick the tile as a (near-)divisor of HW_128
    # targeting 512-2048 lanes (bounds the stats unroll, amortizes per-step overhead).
    l_cols = HW_128 // 128
    bytes_per_lane = N * Cg_pad * (4 * isz + 8)          # apply pass (the tighter one)
    cols_budget = max(1, budget // max(bytes_per_lane, 1) // 128)
    cols_target = max(1, min(l_cols, cols_budget, 16))   # <= 2048 lanes per tile
    best_div = 1
    for k in range(1, min(l_cols, cols_target) + 1):     # tiny trace-time loop
        if l_cols % k == 0:
            best_div = k
    if best_div * 2 >= cols_target or best_div == l_cols:
        cols, KT, l_pad = best_div, l_cols // best_div, l_cols          # zero extra pad
    else:
        KT = pl.cdiv(l_cols, cols_target)
        cols = pl.cdiv(l_cols, KT)
        l_pad = KT * cols                                 # pad < KT columns (tiny)
    T = cols * 128
    HW_pad = l_pad * 128

    xr_p = xr if HW_pad == HW else jnp.pad(
        xr, ((0, 0), (0, 0), (0, 0), (0, HW_pad - HW)))

    coef_spec = pl.BlockSpec((N, 1, Cg, 1), lambda g, t: (0, g, 0, 0))

    # pass 1: accumulate sums over HW tiles, emit affine coefficients A, B
    stats_kernel = functools.partial(_bcn_stats_kernel, bn_eps=float(bn_eps),
                                     gn_eps=float(eps), hw_real=HW)
    stats_cost = pl.CostEstimate(flops=int(4 * N * C * HW_pad),
                                 transcendentals=int(N * C),
                                 bytes_accessed=int(N * C * HW_pad * isz + 8 * N * C))
    a_coef, b_coef = pl.pallas_call(
        stats_kernel,
        out_shape=(jax.ShapeDtypeStruct((N, G, Cg, 1), jnp.float32),
                   jax.ShapeDtypeStruct((N, G, Cg, 1), jnp.float32)),
        grid=(G, KT),
        in_specs=[
            pl.BlockSpec((N, 1, Cg, T), lambda g, t: (0, g, 0, t)),
            pl.BlockSpec((1, 1, 1, 1), lambda g, t: (0, g, 0, 0)),
            pl.BlockSpec((1, 1, 1, 1), lambda g, t: (0, g, 0, 0)),
            pl.BlockSpec((1, 1, Cg, 1), lambda g, t: (0, g, 0, 0)),
            pl.BlockSpec((1, 1, Cg, 1), lambda g, t: (0, g, 0, 0)),
        ],
        out_specs=(coef_spec, coef_spec),
        scratch_shapes=[pltpu.VMEM((N, 1, Cg, 128), jnp.float32),
                        pltpu.VMEM((N, 1, Cg, 128), jnp.float32),
                        pltpu.VMEM((1, 1, Cg, 1), jnp.float32)],
        compiler_params=cparams(("parallel", "arbitrary")),
        cost_estimate=stats_cost,
    )(xr_p, gw, gb, bw, bb)

    # pass 2: fused elementwise apply o = A*x + B (both axes parallel -> both cores
    # stay busy on v7x even when G == 1).
    apply_cost = pl.CostEstimate(flops=int(2 * N * C * HW_pad),
                                 transcendentals=0,
                                 bytes_accessed=int(2 * N * C * HW_pad * isz))
    out = pl.pallas_call(
        _bcn_apply_kernel,
        out_shape=jax.ShapeDtypeStruct((N, G, Cg, HW_pad), x.dtype),
        grid=(G, KT),
        in_specs=[
            pl.BlockSpec((N, 1, Cg, T), lambda g, t: (0, g, 0, t)),
            coef_spec,
            coef_spec,
        ],
        out_specs=pl.BlockSpec((N, 1, Cg, T), lambda g, t: (0, g, 0, t)),
        compiler_params=cparams(("parallel", "parallel")),
        cost_estimate=apply_cost,
    )(xr_p, a_coef, b_coef)

    if HW_pad != HW:
        out = out[..., :HW]
    return out.reshape(N, C, H, W)


# ------------------------------------ reference --------------------------------------

def bcnorm_reference(x, group_weight, group_bias, bn_weight, bn_bias, *,
                     eps: float = 1e-7, bn_eps: float = 1e-5):
    """Pure-JAX mirror of the PyTorch forward (training mode)."""
    N, C, H, W = x.shape
    G = _infer_num_groups(C)
    xf = x.astype(jnp.float32)
    mean_c = xf.mean(axis=(0, 2, 3), keepdims=True)
    var_c = ((xf - mean_c) ** 2).mean(axis=(0, 2, 3), keepdims=True)
    out = (xf - mean_c) / jnp.sqrt(var_c + bn_eps)
    out = out * bn_weight.astype(jnp.float32).reshape(1, C, 1, 1) \
        + bn_bias.astype(jnp.float32).reshape(1, C, 1, 1)
    out = out.reshape(1, N * G, -1)
    m = out.mean(axis=(0, 2), keepdims=True)
    v = ((out - m) ** 2).mean(axis=(0, 2), keepdims=True)
    out = (out - m) / jnp.sqrt(v + eps)
    out = out.reshape(N, G, -1)
    out = group_weight.astype(jnp.float32).reshape(1, G, 1) * out \
        + group_bias.astype(jnp.float32).reshape(1, G, 1)
    return out.reshape(N, C, H, W).astype(x.dtype)


if __name__ == "__main__":
    key = jax.random.PRNGKey(0)
    kx, kgw, kgb, kbw, kbb, kx2, kx3, kx4 = jax.random.split(key, 8)

    N, C, H, W = 2, 32, 16, 16
    G = _infer_num_groups(C)  # -> 2

    x = jax.random.normal(kx, (N, C, H, W), dtype=jnp.float32)
    # Deterministic, non-trivial parameters (shapes from __init__):
    #   BCNorm.weight/bias: (1, G, 1);  BatchNorm2d.weight/bias: (C,)
    group_weight = 1.0 + 0.1 * jax.random.normal(kgw, (1, G, 1), dtype=jnp.float32)
    group_bias = 0.1 * jax.random.normal(kgb, (1, G, 1), dtype=jnp.float32)
    bn_weight = 1.0 + 0.1 * jax.random.normal(kbw, (C,), dtype=jnp.float32)
    bn_bias = 0.1 * jax.random.normal(kbb, (C,), dtype=jnp.float32)

    def check(out, ref, name, rtol=1e-4, atol=1e-4):
        assert out.shape == ref.shape and out.dtype == ref.dtype, name
        o32 = out.astype(jnp.float32)
        r32 = ref.astype(jnp.float32)
        assert jnp.allclose(o32, r32, rtol=rtol, atol=atol), (
            f"{name}: max abs err = {jnp.max(jnp.abs(o32 - r32))}")

    ref = jax.block_until_ready(
        bcnorm_reference(x, group_weight, group_bias, bn_weight, bn_bias))

    # 1) fused path (no wrapper pad/slice; one group block per grid step)
    out = jax.block_until_ready(
        bcnorm_pallas(x, group_weight, group_bias, bn_weight, bn_bias))
    check(out, ref, "fused")

    # 2) tiled two-pass fallback, forced with a tiny tile budget (KT > 1 exercises the
    #    cross-tile accumulation + deferred lane reduction)
    out2 = jax.block_until_ready(
        bcnorm_pallas(x, group_weight, group_bias, bn_weight, bn_bias,
                      force_two_pass=True, vmem_budget_bytes=128 * 1024))
    check(out2, ref, "two-pass")

    # 3) non-multiple-of-128 spatial extent -> unpadded blocks, masked tail stores
    xp = jax.random.normal(kx2, (N, C, 12, 12), dtype=jnp.float32)
    refp = jax.block_until_ready(
        bcnorm_reference(xp, group_weight, group_bias, bn_weight, bn_bias))
    outp = jax.block_until_ready(
        bcnorm_pallas(xp, group_weight, group_bias, bn_weight, bn_bias))
    check(outp, refp, "fused non-aligned")

    # 4) fused path with in-kernel HW chunking (small budget -> 128-lane chunks;
    #    HW = 900 also exercises the ragged tail chunk)
    xc_ = jax.random.normal(kx3, (N, C, 30, 30), dtype=jnp.float32)
    refc = jax.block_until_ready(
        bcnorm_reference(xc_, group_weight, group_bias, bn_weight, bn_bias))
    outc = jax.block_until_ready(
        bcnorm_pallas(xc_, group_weight, group_bias, bn_weight, bn_bias,
                      vmem_budget_bytes=700 * 1024))
    check(outc, refc, "fused chunked")

    # 5) bf16 activations: native-dtype HBM traffic, f32 statistics in-kernel
    xb = jax.random.normal(kx4, (N, C, 16, 16), dtype=jnp.bfloat16)
    refb = jax.block_until_ready(
        bcnorm_reference(xb, group_weight, group_bias, bn_weight, bn_bias))
    outb = jax.block_until_ready(
        bcnorm_pallas(xb, group_weight, group_bias, bn_weight, bn_bias))
    check(outb, refb, "bf16 fused", rtol=5e-2, atol=5e-2)

    print("KERNEL_OK")
</pallas_src>

<mosaic_0001>
module attributes {stable_mosaic.version = 11 : i64} {
  func.func @_bcn_group_kernel(%arg0: i32, %arg1: memref<2x1x16x256xf32, #tpu.memory_space<vmem>>, %arg2: memref<1x1x1x1xf32, #tpu.memory_space<vmem>>, %arg3: memref<1x1x1x1xf32, #tpu.memory_space<vmem>>, %arg4: memref<1x1x16x1xf32, #tpu.memory_space<vmem>>, %arg5: memref<1x1x16x1xf32, #tpu.memory_space<vmem>>, %arg6: memref<2x1x16x256xf32, #tpu.memory_space<vmem>>) attributes {dimension_semantics = [#tpu.dimension_semantics<parallel>], iteration_bounds = array<i64: 2>, scalar_prefetch = 0 : i64, scratch_operands = 0 : i64, tpu.core_type = #tpu.core_type<tc>, window_params = [{transform_indices = @transform_0, window_bounds = array<i64: 2, 1, 16, 256>}, {transform_indices = @transform_1, window_bounds = array<i64: 1, 1, 1, 1>}, {transform_indices = @transform_2, window_bounds = array<i64: 1, 1, 1, 1>}, {transform_indices = @transform_3, window_bounds = array<i64: 1, 1, 16, 1>}, {transform_indices = @transform_4, window_bounds = array<i64: 1, 1, 16, 1>}, {transform_indices = @transform_5, window_bounds = array<i64: 2, 1, 16, 256>}]} {
    %c0 = arith.constant 0 : index
    %c0_0 = arith.constant 0 : index
    %c0_1 = arith.constant 0 : index
    %c0_2 = arith.constant 0 : index
    %0 = vector.load %arg1[%c0, %c0_0, %c0_1, %c0_2] : memref<2x1x16x256xf32, #tpu.memory_space<vmem>>, vector<1x1x16x1xf32>
    %cst = arith.constant 0.000000e+00 : f32
    %1 = vector.broadcast %cst : f32 to vector<2x1x16x1xf32>
    %cst_3 = arith.constant 0.000000e+00 : f32
    %2 = vector.broadcast %cst_3 : f32 to vector<2x1x16x1xf32>
    %c0_i32 = arith.constant 0 : i32
    %c256_i32 = arith.constant 256 : i32
    %3 = arith.muli %c0_i32, %c256_i32 : i32
    %4 = tpu.assume_multiple %3, 128 : i32
    %c0_4 = arith.constant 0 : index
    %c0_5 = arith.constant 0 : index
    %c0_6 = arith.constant 0 : index
    %5 = arith.index_cast %4 : i32 to index
    %6 = vector.load %arg1[%c0_4, %c0_5, %c0_6, %5] : memref<2x1x16x256xf32, #tpu.memory_space<vmem>>, vector<2x1x16x256xf32>
    %7 = vector.broadcast %0 : vector<1x1x16x1xf32> to vector<2x1x16x256xf32>
    %8 = arith.subf %6, %7 : vector<2x1x16x256xf32>
    %cst_7 = arith.constant dense<0.000000e+00> : vector<2x1x16xf32>
    %9 = vector.multi_reduction <add>, %8, %cst_7 [3] : vector<2x1x16x256xf32> to vector<2x1x16xf32>
    %10 = vector.shape_cast %9 : vector<2x1x16xf32> to vector<2x1x16x1xf32>
    %11 = arith.mulf %8, %8 : vector<2x1x16x256xf32>
    %cst_8 = arith.constant dense<0.000000e+00> : vector<2x1x16xf32>
    %12 = vector.multi_reduction <add>, %11, %cst_8 [3] : vector<2x1x16x256xf32> to vector<2x1x16xf32>
    %13 = vector.shape_cast %12 : vector<2x1x16xf32> to vector<2x1x16x1xf32>
    %14 = arith.addf %1, %10 : vector<2x1x16x1xf32>
    %15 = arith.addf %2, %13 : vector<2x1x16x1xf32>
    %c1_i32 = arith.constant 1 : i32
    %c0_9 = arith.constant 0 : index
    %c0_10 = arith.constant 0 : index
    %c0_11 = arith.constant 0 : index
    %c0_12 = arith.constant 0 : index
    %16 = vector.load %arg4[%c0_9, %c0_10, %c0_11, %c0_12] : memref<1x1x16x1xf32, #tpu.memory_space<vmem>>, vector<1x1x16x1xf32>
    %c0_13 = arith.constant 0 : index
    %c0_14 = arith.constant 0 : index
    %c0_15 = arith.constant 0 : index
    %c0_16 = arith.constant 0 : index
    %17 = vector.load %arg5[%c0_13, %c0_14, %c0_15, %c0_16] : memref<1x1x16x1xf32, #tpu.memory_space<vmem>>, vector<1x1x16x1xf32>
    %c0_17 = arith.constant 0 : index
    %c0_18 = arith.constant 0 : index
    %c0_19 = arith.constant 0 : index
    %c0_20 = arith.constant 0 : index
    %18 = vector.load %arg2[%c0_17, %c0_18, %c0_19, %c0_20] : memref<1x1x1x1xf32, #tpu.memory_space<vmem>>, vector<1x1x1x1xf32>
    %c0_21 = arith.constant 0 : index
    %c0_22 = arith.constant 0 : index
    %c0_23 = arith.constant 0 : index
    %c0_24 = arith.constant 0 : index
    %19 = vector.load %arg3[%c0_21, %c0_22, %c0_23, %c0_24] : memref<1x1x1x1xf32, #tpu.memory_space<vmem>>, vector<1x1x1x1xf32>
    %cst_25 = arith.constant dense<0.000000e+00> : vector<1x16x1xf32>
    %20 = vector.multi_reduction <add>, %14, %cst_25 [0] : vector<2x1x16x1xf32> to vector<1x16x1xf32>
    %21 = vector.shape_cast %20 : vector<1x16x1xf32> to vector<1x1x16x1xf32>
    %cst_26 = arith.constant dense<0.000000e+00> : vector<1x16x1xf32>
    %22 = vector.multi_reduction <add>, %15, %cst_26 [0] : vector<2x1x16x1xf32> to vector<1x16x1xf32>
    %23 = vector.shape_cast %22 : vector<1x16x1xf32> to vector<1x1x16x1xf32>
    %cst_27 = arith.constant 0.001953125 : f32
    %24 = vector.broadcast %cst_27 : f32 to vector<1x1x16x1xf32>
    %25 = arith.mulf %21, %24 : vector<1x1x16x1xf32>
    %cst_28 = arith.constant 0.001953125 : f32
    %26 = vector.broadcast %cst_28 : f32 to vector<1x1x16x1xf32>
    %27 = arith.mulf %23, %26 : vector<1x1x16x1xf32>
    %28 = arith.mulf %25, %25 : vector<1x1x16x1xf32>
    %29 = arith.subf %27, %28 : vector<1x1x16x1xf32>
    %cst_29 = arith.constant 9.99999974E-6 : f32
    %30 = vector.broadcast %cst_29 : f32 to vector<1x1x16x1xf32>
    %31 = arith.addf %29, %30 : vector<1x1x16x1xf32>
    %32 = math.rsqrt %31 : vector<1x1x16x1xf32>
    %33 = arith.mulf %16, %32 : vector<1x1x16x1xf32>
    %34 = arith.mulf %33, %25 : vector<1x1x16x1xf32>
    %35 = arith.subf %17, %34 : vector<1x1x16x1xf32>
    %cst_30 = arith.constant 3.906250e-03 : f32
    %36 = vector.broadcast %cst_30 : f32 to vector<2x1x16x1xf32>
    %37 = arith.mulf %14, %36 : vector<2x1x16x1xf32>
    %cst_31 = arith.constant 3.906250e-03 : f32
    %38 = vector.broadcast %cst_31 : f32 to vector<2x1x16x1xf32>
    %39 = arith.mulf %15, %38 : vector<2x1x16x1xf32>
    %40 = vector.broadcast %33 : vector<1x1x16x1xf32> to vector<2x1x16x1xf32>
    %41 = arith.mulf %40, %37 : vector<2x1x16x1xf32>
    %42 = vector.broadcast %35 : vector<1x1x16x1xf32> to vector<2x1x16x1xf32>
    %43 = arith.addf %41, %42 : vector<2x1x16x1xf32>
    %44 = arith.mulf %33, %33 : vector<1x1x16x1xf32>
    %45 = vector.broadcast %44 : vector<1x1x16x1xf32> to vector<2x1x16x1xf32>
    %46 = arith.mulf %45, %39 : vector<2x1x16x1xf32>
    %47 = arith.mulf %33, %35 : vector<1x1x16x1xf32>
    %cst_32 = arith.constant 2.000000e+00 : f32
    %48 = vector.broadcast %cst_32 : f32 to vector<1x1x16x1xf32>
    %49 = arith.mulf %48, %47 : vector<1x1x16x1xf32>
    %50 = vector.broadcast %49 : vector<1x1x16x1xf32> to vector<2x1x16x1xf32>
    %51 = arith.mulf %50, %37 : vector<2x1x16x1xf32>
    %52 = arith.addf %46, %51 : vector<2x1x16x1xf32>
    %53 = arith.mulf %35, %35 : vector<1x1x16x1xf32>
    %54 = vector.broadcast %53 : vector<1x1x16x1xf32> to vector<2x1x16x1xf32>
    %55 = arith.addf %52, %54 : vector<2x1x16x1xf32>
    %cst_33 = arith.constant dense<0.000000e+00> : vector<2x1x1xf32>
    %56 = vector.multi_reduction <add>, %43, %cst_33 [2] : vector<2x1x16x1xf32> to vector<2x1x1xf32>
    %57 = vector.shape_cast %56 : vector<2x1x1xf32> to vector<2x1x1x1xf32>
    %cst_34 = arith.constant 6.250000e-02 : f32
    %58 = vector.broadcast %cst_34 : f32 to vector<2x1x1x1xf32>
    %59 = arith.mulf %57, %58 : vector<2x1x1x1xf32>
    %cst_35 = arith.constant dense<0.000000e+00> : vector<2x1x1xf32>
    %60 = vector.multi_reduction <add>, %55, %cst_35 [2] : vector<2x1x16x1xf32> to vector<2x1x1xf32>
    %61 = vector.shape_cast %60 : vector<2x1x1xf32> to vector<2x1x1x1xf32>
    %cst_36 = arith.constant 6.250000e-02 : f32
    %62 = vector.broadcast %cst_36 : f32 to vector<2x1x1x1xf32>
    %63 = arith.mulf %61, %62 : vector<2x1x1x1xf32>
    %64 = arith.mulf %59, %59 : vector<2x1x1x1xf32>
    %65 = arith.subf %63, %64 : vector<2x1x1x1xf32>
    %cst_37 = arith.constant 1.000000e-07 : f32
    %66 = vector.broadcast %cst_37 : f32 to vector<2x1x1x1xf32>
    %67 = arith.addf %65, %66 : vector<2x1x1x1xf32>
    %68 = math.rsqrt %67 : vector<2x1x1x1xf32>
    %69 = vector.broadcast %18 : vector<1x1x1x1xf32> to vector<2x1x1x1xf32>
    %70 = arith.mulf %69, %68 : vector<2x1x1x1xf32>
    %71 = vector.broadcast %70 : vector<2x1x1x1xf32> to vector<2x1x16x1xf32>
    %72 = vector.broadcast %33 : vector<1x1x16x1xf32> to vector<2x1x16x1xf32>
    %73 = arith.mulf %71, %72 : vector<2x1x16x1xf32>
    %74 = vector.broadcast %18 : vector<1x1x1x1xf32> to vector<2x1x1x1xf32>
    %75 = arith.mulf %74, %68 : vector<2x1x1x1xf32>
    %76 = vector.broadcast %35 : vector<1x1x16x1xf32> to vector<2x1x16x1xf32>
    %77 = vector.broadcast %59 : vector<2x1x1x1xf32> to vector<2x1x16x1xf32>
    %78 = arith.subf %76, %77 : vector<2x1x16x1xf32>
    %79 = vector.broadcast %75 : vector<2x1x1x1xf32> to vector<2x1x16x1xf32>
    %80 = arith.mulf %79, %78 : vector<2x1x16x1xf32>
    %81 = vector.broadcast %19 : vector<1x1x1x1xf32> to vector<2x1x16x1xf32>
    %82 = arith.addf %80, %81 : vector<2x1x16x1xf32>
    %83 = vector.broadcast %0 : vector<1x1x16x1xf32> to vector<2x1x16x1xf32>
    %84 = arith.mulf %73, %83 : vector<2x1x16x1xf32>
    %85 = arith.subf %82, %84 : vector<2x1x16x1xf32>
    %c0_i32_38 = arith.constant 0 : i32
    %c1_i32_39 = arith.constant 1 : i32
    %86 = arith.muli %c0_i32_38, %c1_i32_39 : i32
    %c0_i32_40 = arith.constant 0 : i32
    %87 = arith.addi %c0_i32_40, %86 : i32
    %c256_i32_41 = arith.constant 256 : i32
    %88 = arith.muli %87, %c256_i32_41 : i32
    %89 = tpu.assume_multiple %88, 128 : i32
    %c0_42 = arith.constant 0 : index
    %c0_43 = arith.constant 0 : index
    %c0_44 = arith.constant 0 : index
    %90 = arith.index_cast %89 : i32 to index
    %91 = vector.load %arg1[%c0_42, %c0_43, %c0_44, %90] : memref<2x1x16x256xf32, #tpu.memory_space<vmem>>, vector<2x1x16x256xf32>
    %92 = vector.broadcast %73 : vector<2x1x16x1xf32> to vector<2x1x16x256xf32>
    %93 = arith.mulf %92, %91 : vector<2x1x16x256xf32>
    %94 = vector.broadcast %85 : vector<2x1x16x1xf32> to vector<2x1x16x256xf32>
    %95 = arith.addf %93, %94 : vector<2x1x16x256xf32>
    %c0_45 = arith.constant 0 : index
    %c0_46 = arith.constant 0 : index
    %c0_47 = arith.constant 0 : index
    %96 = arith.index_cast %89 : i32 to index
    %97 = vector.load %arg6[%c0_45, %c0_46, %c0_47, %96] : memref<2x1x16x256xf32, #tpu.memory_space<vmem>>, vector<2x1x16x256xf32>
    tpu.vector_store %arg6[%c0_45, %c0_46, %c0_47, %96], %95 {strides = array<i32>} : memref<2x1x16x256xf32, #tpu.memory_space<vmem>>, vector<2x1x16x256xf32>,
    %c1_i32_48 = arith.constant 1 : i32
    return
  }
  func.func @transform_0(%arg0: i32) -> (i32, i32, i32, i32) {
    %c0_i32 = arith.constant 0 : i32
    %c0_i32_0 = arith.constant 0 : i32
    %c0_i32_1 = arith.constant 0 : i32
    %c0_i32_2 = arith.constant 0 : i32
    return %c0_i32, %arg0, %c0_i32_0, %c0_i32_1 : i32, i32, i32, i32
  }
  func.func @transform_1(%arg0: i32) -> (i32, i32, i32, i32) {
    %c0_i32 = arith.constant 0 : i32
    %c0_i32_0 = arith.constant 0 : i32
    %c0_i32_1 = arith.constant 0 : i32
    %c0_i32_2 = arith.constant 0 : i32
    return %c0_i32, %arg0, %c0_i32_0, %c0_i32_1 : i32, i32, i32, i32
  }
  func.func @transform_2(%arg0: i32) -> (i32, i32, i32, i32) {
    %c0_i32 = arith.constant 0 : i32
    %c0_i32_0 = arith.constant 0 : i32
    %c0_i32_1 = arith.constant 0 : i32
    %c0_i32_2 = arith.constant 0 : i32
    return %c0_i32, %arg0, %c0_i32_0, %c0_i32_1 : i32, i32, i32, i32
  }
  func.func @transform_3(%arg0: i32) -> (i32, i32, i32, i32) {
    %c0_i32 = arith.constant 0 : i32
    %c0_i32_0 = arith.constant 0 : i32
    %c0_i32_1 = arith.constant 0 : i32
    %c0_i32_2 = arith.constant 0 : i32
    return %c0_i32, %arg0, %c0_i32_0, %c0_i32_1 : i32, i32, i32, i32
  }
  func.func @transform_4(%arg0: i32) -> (i32, i32, i32, i32) {
    %c0_i32 = arith.constant 0 : i32
    %c0_i32_0 = arith.constant 0 : i32
    %c0_i32_1 = arith.constant 0 : i32
    %c0_i32_2 = arith.constant 0 : i32
    return %c0_i32, %arg0, %c0_i32_0, %c0_i32_1 : i32, i32, i32, i32
  }
  func.func @transform_5(%arg0: i32) -> (i32, i32, i32, i32) {
    %c0_i32 = arith.constant 0 : i32
    %c0_i32_0 = arith.constant 0 : i32
    %c0_i32_1 = arith.constant 0 : i32
    %c0_i32_2 = arith.constant 0 : i32
    return %c0_i32, %arg0, %c0_i32_0, %c0_i32_1 : i32, i32, i32, i32
  }
}

</mosaic_0001>

<bundles_post_ra>
// kernel: tpu_custom_call.1
= control target key start
LH: loop header
LB: loop body
LE: loop exit
PB: predicated region body
PF: predicated region fallthrough
CT: control target
= control target key end

     0   :  { %10 = vsyncpa [#allocation3], 0  ;;  %s1203_s0 = inlined_call_operand.hbm [shape: f32[2,2,16,256], index: 0, kind: input, shape index: {}]   ;;  %s1204_s1 = inlined_call_operand.vmem [shape: f32[1,2,1,1], index: 1, kind: input, shape index: {}]   ;;  %s1205_s2 = inlined_call_operand.vmem [shape: f32[1,2,1,1], index: 2, kind: input, shape index: {}]   ;;  %s1206_s3 = inlined_call_operand.vmem [shape: f32[1,2,16,1], index: 3, kind: input, shape index: {}]   ;;  %s1207_s4 = inlined_call_operand.vmem [shape: f32[1,2,16,1], index: 4, kind: input, shape index: {}]   ;;  %s1208_s5 = inlined_call_operand.hbm [shape: f32[2,2,16,256], index: 5, kind: output, shape index: {}]  }
   0x1   :  { %12 = vsyncpa [#allocation3 + $0x1], 0 }
   0x2   :  { %13 = vsyncpa [#allocation4], 0 }
   0x3   :  { %15 = vsyncpa [#allocation4 + $0x1], 0  ;;  %s968_s18 = smov 0   ;;  %s970_s19 = smov 0  }
   0x4   :  { %s972_s20 = smov 0   ;;  %s974_s21 = smov 0  }
   0x5 LB: > { %s989_s22 = sadd.s32 4294967295, %s922_s21   ;;  %s781_s23 = sadd.s32 4294967294, %s922_s21   ;;  %s922_s21 = sphi %s974_s21, %s1216_s21   ;;  %s918_s20 = sphi %s972_s20, %s1215_s20   ;;  %s914_s19 = sphi %s970_s19, %s1214_s19   ;;  %s910_s18 = sphi %s968_s18, %s1213_s18  }
   0x6   : > { %s993_s24 = sadd.s32 1, %s922_s21   ;;  %s28_s25 = sadd.s32 1, %s918_s20 }
   0x7   : > { %s25_s26 = ssub.s32 %s922_s21, %s993_s24  ;;  %p35_p0 = scmp.ne.s32.totalorder %s918_s20, %s914_s19 }
   0x8   : > { %p26_p1 = scmp.eq.s32.totalorder %s25_s26, 0  ;;  %p36_p2 = scmp.eq.s32.totalorder %s922_s21, 0 }
   0x9   : > { %p41_p3 = scmp.ne.s32.totalorder %s914_s19, %s910_s18  ;;  %p42_p4 = scmp.eq.s32.totalorder %s989_s22, 0 }
   0xa   : > { %s1005_s27 = scalar_select %p26_p1, %s918_s20, %s28_s25  }
   0xb   : > { %p1007_p5 = por %p36_p2, %p35_p0  ;;  %p1011_p6 = por %p42_p4, %p41_p3 }
   0xc   : > { %p169_p7 = scmp.eq.s32.totalorder %s989_s22, 1  ;;  %p175_p8 = scmp.eq.s32.totalorder %s781_s23, 1 }
   0xd   : > { %p783_p11 = scmp.ge.s32.totalorder %s922_s21, 2 }
   0xe   : > { %p1016_p9 = por %p169_p7, %p35_p0  ;;  %p1020_p10 = por %p175_p8, %p41_p3 }
   0xf   : > { %191 = sbr.rel (%p783_p11) target bundleno = 33 (0x21), region = 16 }
  0x14   : > { %s195_s7 = sand.u32 1, %s918_s20   ;;  %s802_s8 = sshll.u32 %s922_s21, 9 }
  0x15   : > { %s784_s9 = sshll.u32 %s195_s7, 6  ;;  %s205_s12 = scalar_lea.hbm %s1203_s0, %s802_s8 }
  0x16   : > { %s806_s13 = scalar_select %p1007_p5, [#allocation0], [#allocation10] }
  0x17   : > { %s199_s14 = scalar_lea.vmem [#allocation2], %s784_s9  ;;  %s924_s17 = smov 1024  }
  0x18   : > { %s218_s15 = sshll.u32 %s199_s14, 4  ;;  %s210_s16 = sld [smem:[%s806_s13]]   ;;  %s219_s15 = int_to_ptr.vmem [resolvable:$true] %s218_s15 }
  0x19   : > { %807 = sst [smem:[#allocation7]] (%p1007_p5), %s924_s17  ;;  %s925_s23 = smov 512  }
  0x1a   : > { %808 = sst [smem:[#allocation7 + $0x1]] (%p1007_p5), %s925_s23  ;;  %s926_s25 = smov 2  }
  0x1b   : > { %809 = sst [smem:[#allocation7 + $0x2]] (%p1007_p5), %s926_s25  ;;  %s927_s26 = smov 256  }
  0x1c   : > { %810 = sst [smem:[#allocation7 + $0x3]] (%p1007_p5), %s927_s26  ;;  %s928_s9 = smov 16  }
  0x1d   : > { %811 = sst [smem:[#allocation7 + $0x4]] (%p1007_p5), %s927_s26  ;;  %s196_s11 = scalar_lea.sflag [#allocation3], %s195_s7 }
  0x1e   : > { %s787_s8 = sshll.u32 %s210_s16, 26  ;;  %812 = sst [smem:[#allocation7 + $0x5]] (%p1007_p5), %s928_s9 }
  0x1f   : > { %s788_s10 = sadd.s32 134217728, %s787_s8  ;;  %s929_s13 = smov 131072  }
  0x20   : > { %813 = dma.general (%p1007_p5), %s205_s12, 1024, %s219_s15, %s196_s11, %s929_s13, [#allocation7], %s788_s10, 0  }
  0x21 PF: > { %p789_p12 = scmp.ge.s32.totalorder %s922_s21, 1  ;;  %p267_p13 = scmp.lt.s32.totalorder %s922_s21, 3 }
  0x23   : > { %p268_p0 = pnand %p789_p12, %p267_p13 }
  0x24   : > { %s1051_s14 = sand.u32 (!%p268_p0), 1, %s914_s19  }
  0x25   : > { %271 = sbr.rel (%p268_p0) target bundleno = 571 (0x23b), region = 40  ;;  %s790_s16 = sshll.u32 (!%p268_p0), %s1051_s14, 6 }
  0x26   : > { %s274_s17 = scalar_lea.sflag (!%p268_p0), [#allocation3], %s1051_s14  ;;  %s277_s7 = scalar_lea.vmem (!%p268_p0), [#allocation2], %s790_s16 }
  0x2a   : > { %901 = dma.done.wait (%p1011_p6), %s274_s17, 1024  }
  0x2b   : > { %903 = vsyncadd (%p1011_p6), %s274_s17, 4294966272  ;;  %v930_v0 = vmov 0   ;;  %v1061_v1 = vld [vmem:[%s277_s7] sm:$0xff]  ;;  %v1064_v2 = vld [vmem:[%s277_s7 + $0x10] sm:$0xff]  ;;  %p320_p1 = scmp.lt.s32.totalorder %s989_s22, 1  ;;  %vm472_vm0 = vcmask 7168  }
  0x2c   : > { %874 = vset.pattern.permute.xlu0 %v930_v0  ;;  %875 = vset.pattern.permute.xlu1 %v930_v0  ;;  %v1067_v3 = vld [vmem:[%s277_s7 + $0x20] sm:$0xff]  ;;  %v1069_v4 = vld [vmem:[%s277_s7 + $0x28] sm:$0xff]  ;;  %v1077_v11 = vld [vmem:[%s277_s7 + $0x18] sm:$0xff] }
  0x2d   : > { %348 = vperm.xlu0 %874, %v1061_v1   ;;  %v1071_v5 = vld [vmem:[%s277_s7 + $0x8] sm:$0xff]  ;;  %v1079_v15 = vld [vmem:[%s277_s7 + $0x30] sm:$0xff]  ;;  %v1081_v16 = vld [vmem:[%s277_s7 + $0x38] sm:$0xff]  ;;  %s1089_s28 = scalar_select %p320_p1, %s989_s22, 1 }
  0x2f   : > { %s803_s29 = sshll.u32 %s1089_s28, 4  ;;  %s322_s11 = scalar_lea.vmem %s1204_s1, %s1089_s28 }
  0x30   : > { %s330_s23 = scalar_lea.vmem %s1206_s3, %s803_s29  ;;  %s335_s8 = scalar_lea.vmem %s1207_s4, %s803_s29 }
  0x31   : > { %353 = vperm.xlu0 %874, %v1064_v2   ;;  %v404_v57 = vld [vmem:[%s330_s23] sm:$0xff]  ;;  %v405_v61 = vld [vmem:[%s330_s23 + $0x8] sm:$0xff]  ;;  %s325_s7 = scalar_lea.vmem %s1205_s2, %s1089_s28  ;;  %s319_s28 = scalar_lea.vmem [#allocation5], %s790_s16 }
  0x32   : > { %v406_v60 = vld [vmem:[%s335_s8] sm:$0xff]  ;;  %s630_s16 = scalar_lea.sflag [#allocation4], %s1051_s14 }
  0xa8   : > { %v349_v6 = vpop.permute.xlu0 %348 }
  0xa9   : > { %v360_v7 = vsub.f32 %v1067_v3, %v349_v6  ;;  %v361_v8 = vsub.f32 %v1069_v4, %v349_v6  ;;  %v356_v9 = vsub.f32 %v1061_v1, %v349_v6  ;;  %v357_v10 = vsub.f32 %v1071_v5, %v349_v6 }
  0xab   : > { %v370_v12 = vadd.f32 %v361_v8, %v360_v7  ;;  %v364_v13 = vadd.f32 %v357_v10, %v356_v9  ;;  %v376_v23 = vmul.f32 %v356_v9, %v356_v9  ;;  %v377_v24 = vmul.f32 %v357_v10, %v357_v10  ;;  %v407_v9 = vld [vmem:[%s335_s8 + $0x8] sm:$0xff] }
  0xac   : > { %v354_v14 = vpop.permute.xlu0 %353  ;;  %v380_v29 = vmul.f32 %v360_v7, %v360_v7  ;;  %v381_v30 = vmul.f32 %v361_v8, %v361_v8 }
  0xad   : > { %371 = vadd.xlane.f32.xlu0 %v370_v12  ;;  %365 = vadd.xlane.f32.xlu1 %v364_v13  ;;  %v358_v17 = vsub.f32 %v1064_v2, %v354_v14  ;;  %v359_v18 = vsub.f32 %v1077_v11, %v354_v14  ;;  %v362_v20 = vsub.f32 %v1079_v15, %v354_v14 }
  0xae   : > { %v363_v21 = vsub.f32 %v1081_v16, %v354_v14  ;;  %v384_v25 = vadd.f32 %v377_v24, %v376_v23  ;;  %v390_v31 = vadd.f32 %v381_v30, %v380_v29 }
  0xaf   : > { %v367_v19 = vadd.f32 %v359_v18, %v358_v17  ;;  %v378_v26 = vmul.f32 %v358_v17, %v358_v17  ;;  %v379_v27 = vmul.f32 %v359_v18, %v359_v18  ;;  %v382_v32 = vmul.f32 %v362_v20, %v362_v20 }
  0xb0   : > { %v373_v22 = vadd.f32 %v363_v21, %v362_v20  ;;  %v383_v33 = vmul.f32 %v363_v21, %v363_v21 }
  0xb1   : > { %368 = vadd.xlane.f32.xlu1 %v367_v19  ;;  %v387_v28 = vadd.f32 %v379_v27, %v378_v26 }
  0xb2   : > { %v393_v34 = vadd.f32 %v383_v33, %v382_v32 }
  0xb5   : > { %374 = vadd.xlane.f32.xlu1 %v373_v22 }
  0xb9   : > { %385 = vadd.xlane.f32.xlu1 %v384_v25 }
  0xbd   : > { %388 = vadd.xlane.f32.xlu1 %v387_v28 }
  0xc1   : > { %391 = vadd.xlane.f32.xlu1 %v390_v31 }
  0xc5   : > { %394 = vadd.xlane.f32.xlu1 %v393_v34 }
 0x136   : > { %v366_v35 = vpop.xlane.xlu1 %365  ;;  %v372_v38 = vpop.xlane.xlu0 %371 }
 0x137   : > { %v410_v40 = vadd.f32 %v372_v38, %v366_v35  ;;  %v432_v0 = vmul.f32 0.00390625, %v366_v35  ;;  %v434_v6 = vmul.f32 0.00390625, %v372_v38 }
 0x139   : > { %v414_v42 = vmul.f32 0.001953125, %v410_v40 }
 0x13a   : > { %v369_v36 = vpop.xlane.xlu1 %368 }
 0x13b   : > { %v418_v46 = vmul.f32 %v414_v42, %v414_v42  ;;  %v433_v14 = vmul.f32 0.00390625, %v369_v36 }
 0x13e   : > { %v375_v37 = vpop.xlane.xlu1 %374 }
 0x13f   : > { %v411_v43 = vadd.f32 %v375_v37, %v369_v36  ;;  %v435_v17 = vmul.f32 0.00390625, %v375_v37 }
 0x141   : > { %v415_v47 = vmul.f32 0.001953125, %v411_v43 }
 0x142   : > { %v386_v39 = vpop.xlane.xlu1 %385 }
 0x143   : > { %v419_v52 = vmul.f32 %v415_v47, %v415_v47  ;;  %v436_v20 = vmul.f32 0.00390625, %v386_v39 }
 0x146   : > { %v389_v41 = vpop.xlane.xlu1 %388 }
 0x147   : > { %v437_v28 = vmul.f32 0.00390625, %v389_v41 }
 0x14a   : > { %v392_v44 = vpop.xlane.xlu1 %391 }
 0x14b   : > { %v412_v45 = vadd.f32 %v392_v44, %v386_v39  ;;  %v438_v21 = vmul.f32 0.00390625, %v392_v44 }
 0x14d   : > { %v416_v48 = vmul.f32 0.001953125, %v412_v45 }
 0x14e   : > { %v395_v49 = vpop.xlane.xlu1 %394 }
 0x14f   : > { %v420_v50 = vsub.f32 %v416_v48, %v418_v46  ;;  %v413_v51 = vadd.f32 %v395_v49, %v389_v41  ;;  %v439_v36 = vmul.f32 0.00390625, %v395_v49 }
 0x151   : > { %v422_v53 = vadd.f32 1e-05, %v420_v50  ;;  %v417_v54 = vmul.f32 0.001953125, %v413_v51 }
 0x153   : > { %876 = vrsqrt.f32 %v422_v53  ;;  %v421_v55 = vsub.f32 %v417_v54, %v419_v52 }
 0x155   : > { %v423_v56 = vadd.f32 1e-05, %v421_v55 }
 0x157   : > { %878 = vrsqrt.f32 %v423_v56 }
 0x160   : > { %v877_v58 = vpop.eup %876 }
 0x161   : > { %v1098_v59 = vmul.f32 %v877_v58, %v404_v57 }
 0x163   : > { %v428_v62 = vmul.f32 %v1098_v59, %v414_v42  ;;  %v448_v10 = vmul.f32 %v1098_v59, %v1098_v59  ;;  %v440_v12 = vmul.f32 %v432_v0, %v1098_v59  ;;  %v442_v13 = vmul.f32 %v434_v6, %v1098_v59 }
 0x164   : > { %v879_v63 = vpop.eup %878 }
 0x165   : > { %v1101_v7 = vsub.f32 %v406_v60, %v428_v62  ;;  %v1103_v8 = vmul.f32 %v879_v63, %v405_v61  ;;  %v450_v29 = vmul.f32 %v448_v10, %v436_v20  ;;  %v452_v30 = vmul.f32 %v448_v10, %v438_v21 }
 0x167   : > { %v454_v18 = vmul.f32 %v1101_v7, %v1098_v59  ;;  %v429_v19 = vmul.f32 %v1103_v8, %v415_v47  ;;  %v444_v22 = vadd.f32 %v440_v12, %v1101_v7  ;;  %v446_v23 = vadd.f32 %v442_v13, %v1101_v7 }
 0x168   : > { %v441_v26 = vmul.f32 %v433_v14, %v1103_v8  ;;  %v443_v27 = vmul.f32 %v435_v17, %v1103_v8  ;;  %v449_v31 = vmul.f32 %v1103_v8, %v1103_v8  ;;  %v466_v47 = vmul.f32 %v1101_v7, %v1101_v7 }
 0x169   : > { %v456_v24 = vmul.f32 2.0, %v454_v18  ;;  %v1114_v25 = vsub.f32 %v407_v9, %v429_v19  ;;  %v473_v38 = vsel %vm472_vm0, %v444_v22, 0.0  ;;  %v482_v39 = vsel %vm472_vm0, %v446_v23, 0.0 }
 0x16a   : > { %v451_v48 = vmul.f32 %v449_v31, %v437_v28  ;;  %v453_v49 = vmul.f32 %v449_v31, %v439_v36 }
 0x16b   : > { %v458_v32 = vmul.f32 %v456_v24, %v432_v0  ;;  %v460_v33 = vmul.f32 %v456_v24, %v434_v6  ;;  %v445_v34 = vadd.f32 %v441_v26, %v1114_v25  ;;  %v447_v35 = vadd.f32 %v443_v27, %v1114_v25 }
 0x16c   : > { %v455_v37 = vmul.f32 %v1114_v25, %v1103_v8  ;;  %v467_v56 = vmul.f32 %v1114_v25, %v1114_v25 }
 0x16d   : > { %v462_v40 = vadd.f32 %v458_v32, %v450_v29  ;;  %v464_v41 = vadd.f32 %v460_v33, %v452_v30  ;;  %v474_v42 = vsel %vm472_vm0, %v445_v34, 0.0  ;;  %v483_v43 = vsel %vm472_vm0, %v447_v35, 0.0 }
 0x16e   : > { %v457_v44 = vmul.f32 2.0, %v455_v37  ;;  %v475_v45 = vadd.f32 %v474_v42, %v473_v38  ;;  %v484_v46 = vadd.f32 %v483_v43, %v482_v39 }
 0x16f   : > { %v468_v54 = vadd.f32 %v466_v47, %v462_v40  ;;  %v470_v55 = vadd.f32 %v466_v47, %v464_v41  ;;  %v525_v47 = vlaneseq }
 0x170   : > { %v459_v50 = vmul.f32 %v457_v44, %v433_v14  ;;  %v461_v51 = vmul.f32 %v457_v44, %v435_v17  ;;  %v476_v52 = vrot.slane %v475_v45, 4  ;;  %v485_v53 = vrot.slane %v484_v46, 4 }
 0x171   : > { %v493_v9 = vsel %vm472_vm0, %v468_v54, 0.0  ;;  %v502_v10 = vsel %vm472_vm0, %v470_v55, 0.0 }
 0x172   : > { %v463_v57 = vadd.f32 %v459_v50, %v451_v48  ;;  %v465_v58 = vadd.f32 %v461_v51, %v453_v49  ;;  %v477_v60 = vadd.f32 %v476_v52, %v475_v45  ;;  %v486_v61 = vadd.f32 %v485_v53, %v484_v46  ;;  %v408_v49 = vld [vmem:[%s322_s11] sm:$0x1] }
 0x173   : > { %v526_v48 = vshrl.u32 %v525_v47, 7 }
 0x174   : > { %v469_v62 = vadd.f32 %v467_v56, %v463_v57  ;;  %v471_v63 = vadd.f32 %v467_v56, %v465_v58  ;;  %v478_v0 = vrot.slane %v477_v60, 2  ;;  %v487_v6 = vrot.slane %v486_v61, 2 }
 0x175   : > { %v527_v50 = vsub.s32 0, %v526_v48 }
 0x176   : > { %v479_v12 = vadd.f32 %v478_v0, %v477_v60  ;;  %v488_v13 = vadd.f32 %v487_v6, %v486_v61  ;;  %v494_v14 = vsel %vm472_vm0, %v469_v62, 0.0  ;;  %v503_v17 = vsel %vm472_vm0, %v471_v63, 0.0  ;;  %v796_v61 = vld [vmem:[%s325_s7] ss:$0 sm:$0xff] }
 0x177   : > { %v495_v18 = vadd.f32 %v494_v14, %v493_v9  ;;  %v504_v19 = vadd.f32 %v503_v17, %v502_v10 }
 0x178   : > { %v480_v20 = vrot.slane %v479_v12, 1  ;;  %v489_v21 = vrot.slane %v488_v13, 1 }
 0x179   : > { %v496_v22 = vrot.slane %v495_v18, 4  ;;  %v505_v23 = vrot.slane %v504_v19, 4 }
 0x17a   : > { %v481_v27 = vadd.f32 %v480_v20, %v479_v12  ;;  %v490_v28 = vadd.f32 %v489_v21, %v488_v13 }
 0x17b   : > { %v497_v24 = vadd.f32 %v496_v22, %v495_v18  ;;  %v506_v26 = vadd.f32 %v505_v23, %v504_v19 }
 0x17c   : > { %v491_v33 = vmul.f32 0.0625, %v481_v27  ;;  %v492_v34 = vmul.f32 0.0625, %v490_v28 }
 0x17d   : > { %v498_v29 = vrot.slane %v497_v24, 2  ;;  %v507_v30 = vrot.slane %v506_v26, 2 }
 0x17e   : > { %v513_v41 = vmul.f32 %v491_v33, %v491_v33  ;;  %v514_v42 = vmul.f32 %v492_v34, %v492_v34  ;;  %v541_v57 = vsub.f32 %v1101_v7, %v492_v34  ;;  %v539_v0 = vsub.f32 %v1101_v7, %v491_v33 }
 0x17f   : > { %v499_v31 = vadd.f32 %v498_v29, %v497_v24  ;;  %v508_v32 = vadd.f32 %v507_v30, %v506_v26  ;;  %v540_v13 = vsub.f32 %v1114_v25, %v491_v33  ;;  %v542_v19 = vsub.f32 %v1114_v25, %v492_v34 }
 0x181   : > { %v500_v35 = vrot.slane %v499_v31, 1  ;;  %v509_v36 = vrot.slane %v508_v32, 1 }
 0x183   : > { %v501_v37 = vadd.f32 %v500_v35, %v499_v31  ;;  %v510_v38 = vadd.f32 %v509_v36, %v508_v32 }
 0x185   : > { %v511_v39 = vmul.f32 0.0625, %v501_v37  ;;  %v512_v40 = vmul.f32 0.0625, %v510_v38 }
 0x187   : > { %v515_v43 = vsub.f32 %v511_v39, %v513_v41  ;;  %v516_v44 = vsub.f32 %v512_v40, %v514_v42 }
 0x189   : > { %v517_v45 = vadd.f32 1e-07, %v515_v43  ;;  %v518_v46 = vadd.f32 1e-07, %v516_v44 }
 0x18b   : > { %880 = vrsqrt.f32 %v517_v45 }
 0x18c   : > { %882 = vrsqrt.f32 %v518_v46 }
 0x198   : > { %v881_v51 = vpop.eup %880 }
 0x199   : > { %v883_v52 = vpop.eup %882  ;;  %v521_v53 = vmul.f32 %v881_v51, %v408_v49 }
 0x19a   : > { %v522_v54 = vmul.f32 %v883_v52, %v408_v49 }
 0x19b   : > { %v528_v55 = vrot.slane %v521_v53, %v527_v50 }
 0x19c   : > { %v532_v56 = vrot.slane %v522_v54, %v527_v50 }
 0x19d   : > { %v536_v58 = vmul.f32 %v528_v55, %v1103_v8  ;;  %v535_v60 = vmul.f32 %v528_v55, %v1098_v59  ;;  %v543_v10 = vmul.f32 %v539_v0, %v528_v55 }
 0x19e   : > { %v537_v62 = vmul.f32 %v532_v56, %v1098_v59  ;;  %v545_v63 = vmul.f32 %v541_v57, %v532_v56  ;;  %v538_v14 = vmul.f32 %v532_v56, %v1103_v8  ;;  %v544_v59 = vmul.f32 %v540_v13, %v528_v55 }
 0x19f   : > { %572 = vperm.xlu0 %874, %v536_v58   ;;  %567 = vperm.xlu1 %875, %v535_v60   ;;  %v553_v17 = vadd.f32 %v796_v61, %v543_v10  ;;  %v557_v18 = vmul.f32 %v535_v60, %v1061_v1  ;;  %v558_v21 = vmul.f32 %v536_v58, %v1064_v2 }
 0x1a0   : > { %v555_v6 = vadd.f32 %v796_v61, %v545_v63  ;;  %v559_v9 = vmul.f32 %v537_v62, %v1061_v1  ;;  %v554_v7 = vadd.f32 %v796_v61, %v544_v59  ;;  %v546_v22 = vmul.f32 %v542_v19, %v532_v56 }
 0x1a1   : > { %v561_v20 = vsub.f32 %v553_v17, %v557_v18  ;;  %v560_v26 = vmul.f32 %v538_v14, %v1064_v2 }
 0x1a2   : > { %v563_v12 = vsub.f32 %v555_v6, %v559_v9  ;;  %v562_v23 = vsub.f32 %v554_v7, %v558_v21  ;;  %v556_v24 = vadd.f32 %v796_v61, %v546_v22 }
 0x1a3   : > { %577 = vperm.xlu1 %875, %v537_v62  }
 0x1a4   : > { %605 = vperm.xlu0 %874, %v563_v12   ;;  %v564_v8 = vsub.f32 %v556_v24, %v560_v26 }
 0x1a7   : > { %582 = vperm.xlu1 %875, %v538_v14  }
 0x1ab   : > { %595 = vperm.xlu1 %875, %v561_v20  }
 0x1af   : > { %600 = vperm.xlu1 %875, %v562_v23  }
 0x1b3   : > { %610 = vperm.xlu1 %875, %v564_v8  }
 0x21a   : > { %v573_v27 = vpop.permute.xlu0 %572  ;;  %v568_v28 = vpop.permute.xlu1 %567 }
 0x21b   : > { %v585_v35 = vmul.f32 %v568_v28, %v1061_v1  ;;  %v586_v36 = vmul.f32 %v568_v28, %v1071_v5  ;;  %v587_v40 = vmul.f32 %v573_v27, %v1064_v2 }
 0x21e   : > { %v578_v29 = vpop.permute.xlu1 %577 }
 0x21f   : > { %v589_v30 = vmul.f32 %v578_v29, %v1067_v3  ;;  %v590_v25 = vmul.f32 %v578_v29, %v1069_v4  ;;  %v606_v31 = vpop.permute.xlu0 %605  ;;  %v588_v3 = vmul.f32 %v573_v27, %v1077_v11 }
 0x221   : > { %v617_v32 = vadd.f32 %v606_v31, %v589_v30  ;;  %v618_v33 = vadd.f32 %v606_v31, %v590_v25 }
 0x222   : > { %v583_v34 = vpop.permute.xlu1 %582 }
 0x223   : > { %625 = vst [vmem:[%s319_s28 + $0x20] sm:$0xff] %v617_v32  ;;  %626 = vst [vmem:[%s319_s28 + $0x28] sm:$0xff] %v618_v33  ;;  %v591_v43 = vmul.f32 %v583_v34, %v1079_v15  ;;  %v592_v44 = vmul.f32 %v583_v34, %v1081_v16 }
 0x226   : > { %v596_v37 = vpop.permute.xlu1 %595 }
 0x227   : > { %v613_v38 = vadd.f32 %v596_v37, %v585_v35  ;;  %v614_v39 = vadd.f32 %v596_v37, %v586_v36 }
 0x229   : > { %621 = vst [vmem:[%s319_s28] sm:$0xff] %v613_v38  ;;  %622 = vst [vmem:[%s319_s28 + $0x8] sm:$0xff] %v614_v39 }
 0x22a   : > { %v601_v4 = vpop.permute.xlu1 %600 }
 0x22b   : > { %v615_v41 = vadd.f32 %v601_v4, %v587_v40  ;;  %v616_v42 = vadd.f32 %v601_v4, %v588_v3 }
 0x22d   : > { %623 = vst [vmem:[%s319_s28 + $0x10] sm:$0xff] %v615_v41  ;;  %624 = vst [vmem:[%s319_s28 + $0x18] sm:$0xff] %v616_v42 }
 0x22e   : > { %v611_v1 = vpop.permute.xlu1 %610 }
 0x22f   : > { %v619_v5 = vadd.f32 %v611_v1, %v591_v43  ;;  %v620_v45 = vadd.f32 %v611_v1, %v592_v44 }
 0x231   : > { %627 = vst [vmem:[%s319_s28 + $0x30] sm:$0xff] %v619_v5  ;;  %628 = vst [vmem:[%s319_s28 + $0x38] sm:$0xff] %v620_v45 }
 0x232   : > { %s805_s29 = sshll.u32 %s989_s22, 9  ;;  %s653_s12 = sshll.u32 %s319_s28, 4  ;;  %s654_s12 = int_to_ptr.vmem [resolvable:$true] %s653_s12 }
 0x233   : > { %s642_s25 = scalar_lea.hbm %s1208_s5, %s805_s29  ;;  %s931_s26 = smov 512  }
 0x234   : > { %815 = sst [smem:[#allocation9]] (%p1016_p9), %s931_s26  ;;  %s932_s8 = smov 1024  }
 0x235   : > { %816 = sst [smem:[#allocation9 + $0x1]] (%p1016_p9), %s932_s8  ;;  %s933_s14 = smov 2  }
 0x236   : > { %817 = sst [smem:[#allocation9 + $0x2]] (%p1016_p9), %s933_s14  ;;  %s934_s9 = smov 256  }
 0x237   : > { %818 = sst [smem:[#allocation9 + $0x3]] (%p1016_p9), %s934_s9  ;;  %s935_s22 = smov 16  }
 0x238   : > { %819 = sst [smem:[#allocation9 + $0x4]] (%p1016_p9), %s934_s9  ;;  %s936_s10 = smov 131072  }
 0x239   : > { %820 = sst [smem:[#allocation9 + $0x5]] (%p1016_p9), %s935_s22  ;;  %s937_s11 = smov 0  }
 0x23a   : > { %821 = dma.general (%p1016_p9), %s654_s12, 1024, %s642_s25, %s630_s16, %s936_s10, [#allocation9], %s937_s11, 0  }
 0x23b PF: > { %s681_s13 = sand.u32 1, %s910_s18   ;;  %p824_p2 = pnand %p783_p11, %p1020_p10 }
 0x23c   : > { %s682_s17 = scalar_lea.sflag [#allocation4], %s681_s13 }
 0x23d   : > { %p825_p3 = pneg %p824_p2 }
 0x23f   : > { %905 = dma.done.wait (%p825_p3), %s682_s17, 1024  }
 0x240   : > { %907 = vsyncadd (%p825_p3), %s682_s17, 4294966272  ;;  %p18_p4 = scmp.ge.s32.totalorder %s993_s24, 4   ;;  %s1213_s18 = smov %s914_s19 }
 0x241   : > { %s1214_s19 = smov %s918_s20  ;;  %s1215_s20 = smov %s1005_s27 }
 0x242   : > { %s1216_s21 = smov %s993_s24  ;;  %20 = sbr.rel (!%p18_p4) target bundleno = 5 (0x5), region = 107 }
 0x247   :  { %687 = vsyncpa [#allocation3], 1 }
 0x248   :  { %689 = vsyncpa [#allocation3 + $0x1], 1 }
 0x249   :  { %690 = vsyncpa [#allocation4], 1 }
 0x24a   :  { %692 = vsyncpa [#allocation4 + $0x1], 1 }

</bundles_post_ra>
